<compile_context>
chip_gen: v7x
topology: tpu7x:2x2x1
jax: 0.10.0
libtpu: 0.0.40
codegen_flags: <defaults>
</compile_context>

<pallas_src>
import jax
import jax.numpy as jnp
from jax import lax
from jax.experimental import pallas as pl
from jax.experimental.pallas import tpu as pltpu

LANE = 128
SUBLANE = 8


def _round_up(x, m):
    return (x + m - 1) // m * m


def _row_align(*dtypes):
    # Packed sublane tile: 8 rows for 4-byte, 16 for 2-byte, 32 for 1-byte dtypes.
    return max(SUBLANE, *(32 // jnp.dtype(d).itemsize for d in dtypes))


def _dice_partials_kernel(*, tm, steps, valid_rows, may_need_mask):
    """Accumulate per-split partial sums of pred*target and pred+target."""
    folds = tm // SUBLANE

    def _fold(x):
        # (tm, LANE) f32 -> (1, 8, LANE): sublane-tile-aligned reshape + pure
        # VPU adds over the leading axis (no XLU cross-lane work).
        if folds == 1:
            return x[None]
        return x.reshape(folds, SUBLANE, LANE).sum(axis=0)[None]

    def kernel(pred_ref, target_ref, inter_ref, sum_ref):
        c = pl.program_id(0)      # split index (TensorCore shard on megacore parts)
        i = pl.program_id(1)      # step within split (reduction axis)

        @pl.when(i == 0)
        def _():
            inter_ref[...] = jnp.zeros_like(inter_ref)
            sum_ref[...] = jnp.zeros_like(sum_ref)

        p = pred_ref[...].astype(jnp.float32)
        t = target_ref[...].astype(jnp.float32)
        pt = p * t      # intersection contribution
        ps = p + t      # pred.sum() + target.sum() folded into one accumulator

        if may_need_mask:
            gb = c * steps + i                     # logical (unclamped) block index
            is_tail = (gb + 1) * tm > valid_rows   # block reaches past the valid rows

            @pl.when(jnp.logical_not(is_tail))
            def _():
                inter_ref[...] += _fold(pt)
                sum_ref[...] += _fold(ps)

            @pl.when(is_tail)
            def _():
                row_ids = gb * tm + lax.broadcasted_iota(jnp.int32, (tm, LANE), 0)
                valid = row_ids < valid_rows
                inter_ref[...] += _fold(jnp.where(valid, pt, 0.0))
                sum_ref[...] += _fold(jnp.where(valid, ps, 0.0))
        else:
            inter_ref[...] += _fold(pt)
            sum_ref[...] += _fold(ps)

    return kernel


def dice_loss(pred, target, smooth=1.0, *, num_splits=2, max_block_bytes=2 << 20):
    """Pallas implementation of DiceLoss.forward (global reduction over all elems)."""
    assert pred.shape == target.shape
    assert num_splits >= 1
    total = pred.size

    # Flatten to lane-major (rows, 128). Zero-pad only when total % 128 != 0.
    # TODO(synk): fold the trailing <128 lane-ragged elements into the tail
    # mask instead of paying the jnp.pad copy (rare for NCHW shapes).
    pad = (-total) % LANE
    p = pred.reshape(-1)
    t = target.reshape(-1)
    if pad:
        p = jnp.pad(p, (0, pad))
        t = jnp.pad(t, (0, pad))
    rows = (total + pad) // LANE
    p = p.reshape(rows, LANE)
    t = t.reshape(rows, LANE)

    # Row-tile selection: per-input byte budget, rounded to the packed sublane
    # tile of the input dtype (8 rows f32, 16 rows bf16, 32 rows int8).
    align = _row_align(pred.dtype, target.dtype)
    itemsize = max(pred.dtype.itemsize, target.dtype.itemsize)
    tm_cap = max(align, (max_block_bytes // (LANE * itemsize)) // align * align)
    rows_per_split = pl.cdiv(rows, num_splits)
    tm = min(tm_cap, _round_up(rows_per_split, align))
    steps = pl.cdiv(rows_per_split, tm)
    num_blocks = pl.cdiv(rows, tm)
    may_need_mask = (rows % tm != 0) or (num_splits * steps != num_blocks)
    last_block = num_blocks - 1

    def in_map(c, i):
        # Clamp: grid points past the last real block re-read it; their
        # contribution is zeroed by the in-kernel mask, so no double counting.
        return (jnp.minimum(c * steps + i, last_block), 0)

    def out_map(c, i):
        return (c, 0, 0)

    kernel = _dice_partials_kernel(tm=tm, steps=steps, valid_rows=rows,
                                   may_need_mask=may_need_mask)

    in_block_bytes = tm * LANE * (pred.dtype.itemsize + target.dtype.itemsize)
    f32_block_bytes = tm * LANE * 4
    vmem_limit = min(50 << 20,
                     max(16 << 20,
                         2 * in_block_bytes + 10 * f32_block_bytes + (2 << 20)))

    cost = pl.CostEstimate(
        flops=4 * total,
        transcendentals=0,
        bytes_accessed=total * (pred.dtype.itemsize + target.dtype.itemsize),
    )

    inter_p, sum_p = pl.pallas_call(
        kernel,
        out_shape=(
            jax.ShapeDtypeStruct((num_splits, SUBLANE, LANE), jnp.float32),
            jax.ShapeDtypeStruct((num_splits, SUBLANE, LANE), jnp.float32),
        ),
        grid_spec=pltpu.PrefetchScalarGridSpec(
            num_scalar_prefetch=0,
            grid=(num_splits, steps),
            in_specs=[
                pl.BlockSpec((tm, LANE), in_map),
                pl.BlockSpec((tm, LANE), in_map),
            ],
            out_specs=[
                pl.BlockSpec((1, SUBLANE, LANE), out_map),
                pl.BlockSpec((1, SUBLANE, LANE), out_map),
            ],
        ),
        compiler_params=pltpu.CompilerParams(
            dimension_semantics=("parallel", "arbitrary"),
            vmem_limit_bytes=vmem_limit,
        ),
        cost_estimate=cost,
    )(p, t)

    # Tiny epilogue in plain JAX: reduce the (num_splits, 8, 128) partials and
    # form the dice score.
    intersection = jnp.sum(inter_p)
    total_sum = jnp.sum(sum_p)
    dice = (2.0 * intersection + float(smooth)) / (total_sum + float(smooth))
    return 1.0 - dice


def _ref_dice_loss(pred, target, smooth=1.0):
    p = pred.astype(jnp.float32)
    t = target.astype(jnp.float32)
    inter = jnp.sum(p * t)
    return 1.0 - (2.0 * inter + smooth) / (jnp.sum(p) + jnp.sum(t) + smooth)


if __name__ == "__main__":
    key = jax.random.PRNGKey(0)
    k1, k2, k3, k4, k5, k6 = jax.random.split(key, 6)

    # 1) Typical segmentation loss shapes: pred = sigmoid logits, target = binary mask.
    shape = (2, 4, 16, 16)  # N, C, H, W
    pred = jax.nn.sigmoid(jax.random.normal(k1, shape, dtype=jnp.float32))
    target = (jax.random.uniform(k2, shape) > 0.5).astype(jnp.float32)
    loss = jax.block_until_ready(dice_loss(pred, target, smooth=1.0))
    ref = _ref_dice_loss(pred, target, smooth=1.0)
    assert jnp.allclose(loss, ref, rtol=1e-5, atol=1e-6), (loss, ref)

    # 2) Lane-ragged total + small tiles: exercises the pad path, the per-split
    #    multi-block coverage, index clamping and the gated tail mask.
    shape2 = (1, 1, 36, 33)  # 1188 elems -> 10 rows of 128
    pred2 = jax.nn.sigmoid(jax.random.normal(k3, shape2, dtype=jnp.float32))
    target2 = (jax.random.uniform(k4, shape2) > 0.5).astype(jnp.float32)
    loss2 = jax.block_until_ready(
        dice_loss(pred2, target2, smooth=1.0, max_block_bytes=SUBLANE * LANE * 4))
    ref2 = _ref_dice_loss(pred2, target2, smooth=1.0)
    assert jnp.allclose(loss2, ref2, rtol=1e-5, atol=1e-6), (loss2, ref2)

    # 3) bf16 inputs: exercises the 16-row packed sublane alignment + in-kernel f32 cast.
    pred3 = jax.nn.sigmoid(jax.random.normal(k5, shape, dtype=jnp.float32)).astype(jnp.bfloat16)
    target3 = (jax.random.uniform(k6, shape) > 0.5).astype(jnp.bfloat16)
    loss3 = jax.block_until_ready(dice_loss(pred3, target3, smooth=1.0))
    ref3 = _ref_dice_loss(pred3, target3, smooth=1.0)
    assert jnp.allclose(loss3, ref3, rtol=1e-4, atol=1e-5), (loss3, ref3)

    print("KERNEL_OK")
</pallas_src>

<mosaic_0001>
module attributes {stable_mosaic.version = 11 : i64} {
  func.func @kernel(%arg0: i32, %arg1: i32, %arg2: memref<8x128xf32, #tpu.memory_space<vmem>>, %arg3: memref<8x128xf32, #tpu.memory_space<vmem>>, %arg4: memref<1x8x128xf32, #tpu.memory_space<vmem>>, %arg5: memref<1x8x128xf32, #tpu.memory_space<vmem>>) attributes {dimension_semantics = [#tpu.dimension_semantics<parallel>, #tpu.dimension_semantics<arbitrary>], iteration_bounds = array<i64: 2, 1>, scalar_prefetch = 0 : i64, scratch_operands = 0 : i64, tpu.core_type = #tpu.core_type<tc>, window_params = [{transform_indices = @transform_0, window_bounds = array<i64: 8, 128>}, {transform_indices = @transform_1, window_bounds = array<i64: 8, 128>}, {transform_indices = @transform_2, window_bounds = array<i64: 1, 8, 128>}, {transform_indices = @transform_3, window_bounds = array<i64: 1, 8, 128>}]} {
    %c0_i32 = arith.constant 0 : i32
    %0 = arith.cmpi eq, %arg1, %c0_i32 : i32
    %1 = arith.extui %0 : i1 to i32
    %c0_i32_0 = arith.constant 0 : i32
    %2 = arith.cmpi ne, %1, %c0_i32_0 : i32
    scf.if %2 {
      %cst = arith.constant 0.000000e+00 : f32
      %15 = vector.broadcast %cst : f32 to vector<1x8x128xf32>
      %c0_16 = arith.constant 0 : index
      %c0_17 = arith.constant 0 : index
      %c0_18 = arith.constant 0 : index
      %16 = vector.load %arg4[%c0_16, %c0_17, %c0_18] : memref<1x8x128xf32, #tpu.memory_space<vmem>>, vector<1x8x128xf32>
      tpu.vector_store %arg4[%c0_16, %c0_17, %c0_18], %15 {strides = array<i32>} : memref<1x8x128xf32, #tpu.memory_space<vmem>>, vector<1x8x128xf32>,
      %cst_19 = arith.constant 0.000000e+00 : f32
      %17 = vector.broadcast %cst_19 : f32 to vector<1x8x128xf32>
      %c0_20 = arith.constant 0 : index
      %c0_21 = arith.constant 0 : index
      %c0_22 = arith.constant 0 : index
      %18 = vector.load %arg5[%c0_20, %c0_21, %c0_22] : memref<1x8x128xf32, #tpu.memory_space<vmem>>, vector<1x8x128xf32>
      tpu.vector_store %arg5[%c0_20, %c0_21, %c0_22], %17 {strides = array<i32>} : memref<1x8x128xf32, #tpu.memory_space<vmem>>, vector<1x8x128xf32>,
    } else {
    }
    %c0 = arith.constant 0 : index
    %c0_1 = arith.constant 0 : index
    %3 = vector.load %arg2[%c0, %c0_1] : memref<8x128xf32, #tpu.memory_space<vmem>>, vector<8x128xf32>
    %c0_2 = arith.constant 0 : index
    %c0_3 = arith.constant 0 : index
    %4 = vector.load %arg3[%c0_2, %c0_3] : memref<8x128xf32, #tpu.memory_space<vmem>>, vector<8x128xf32>
    %5 = arith.mulf %3, %4 : vector<8x128xf32>
    %6 = arith.addf %3, %4 : vector<8x128xf32>
    %c0_4 = arith.constant 0 : index
    %c0_5 = arith.constant 0 : index
    %c0_6 = arith.constant 0 : index
    %7 = vector.load %arg4[%c0_4, %c0_5, %c0_6] : memref<1x8x128xf32, #tpu.memory_space<vmem>>, vector<1x8x128xf32>
    %8 = vector.shape_cast %5 : vector<8x128xf32> to vector<1x8x128xf32>
    %9 = arith.addf %7, %8 : vector<1x8x128xf32>
    %c0_7 = arith.constant 0 : index
    %c0_8 = arith.constant 0 : index
    %c0_9 = arith.constant 0 : index
    %10 = vector.load %arg4[%c0_7, %c0_8, %c0_9] : memref<1x8x128xf32, #tpu.memory_space<vmem>>, vector<1x8x128xf32>
    tpu.vector_store %arg4[%c0_7, %c0_8, %c0_9], %9 {strides = array<i32>} : memref<1x8x128xf32, #tpu.memory_space<vmem>>, vector<1x8x128xf32>,
    %c0_10 = arith.constant 0 : index
    %c0_11 = arith.constant 0 : index
    %c0_12 = arith.constant 0 : index
    %11 = vector.load %arg5[%c0_10, %c0_11, %c0_12] : memref<1x8x128xf32, #tpu.memory_space<vmem>>, vector<1x8x128xf32>
    %12 = vector.shape_cast %6 : vector<8x128xf32> to vector<1x8x128xf32>
    %13 = arith.addf %11, %12 : vector<1x8x128xf32>
    %c0_13 = arith.constant 0 : index
    %c0_14 = arith.constant 0 : index
    %c0_15 = arith.constant 0 : index
    %14 = vector.load %arg5[%c0_13, %c0_14, %c0_15] : memref<1x8x128xf32, #tpu.memory_space<vmem>>, vector<1x8x128xf32>
    tpu.vector_store %arg5[%c0_13, %c0_14, %c0_15], %13 {strides = array<i32>} : memref<1x8x128xf32, #tpu.memory_space<vmem>>, vector<1x8x128xf32>,
    return
  }
  func.func @transform_0(%arg0: i32, %arg1: i32) -> (i32, i32) {
    %c1_i32 = arith.constant 1 : i32
    %0 = arith.muli %arg0, %c1_i32 : i32
    %1 = arith.addi %0, %arg1 : i32
    %c1_i32_0 = arith.constant 1 : i32
    %2 = arith.minsi %1, %c1_i32_0 : i32
    %c0_i32 = arith.constant 0 : i32
    %c0_i32_1 = arith.constant 0 : i32
    return %2, %c0_i32 : i32, i32
  }
  func.func @transform_1(%arg0: i32, %arg1: i32) -> (i32, i32) {
    %c1_i32 = arith.constant 1 : i32
    %0 = arith.muli %arg0, %c1_i32 : i32
    %1 = arith.addi %0, %arg1 : i32
    %c1_i32_0 = arith.constant 1 : i32
    %2 = arith.minsi %1, %c1_i32_0 : i32
    %c0_i32 = arith.constant 0 : i32
    %c0_i32_1 = arith.constant 0 : i32
    return %2, %c0_i32 : i32, i32
  }
  func.func @transform_2(%arg0: i32, %arg1: i32) -> (i32, i32, i32) {
    %c0_i32 = arith.constant 0 : i32
    %c0_i32_0 = arith.constant 0 : i32
    %c0_i32_1 = arith.constant 0 : i32
    return %arg0, %c0_i32, %c0_i32_0 : i32, i32, i32
  }
  func.func @transform_3(%arg0: i32, %arg1: i32) -> (i32, i32, i32) {
    %c0_i32 = arith.constant 0 : i32
    %c0_i32_0 = arith.constant 0 : i32
    %c0_i32_1 = arith.constant 0 : i32
    return %arg0, %c0_i32, %c0_i32_0 : i32, i32, i32
  }
}

</mosaic_0001>

<bundles_post_ra>
// kernel: tpu_custom_call.1
= control target key start
LH: loop header
LB: loop body
LE: loop exit
PB: predicated region body
PF: predicated region fallthrough
CT: control target
= control target key end

     0   :  { %s1079_s0 = inlined_call_operand.hbm [shape: f32[16,128], index: 0, kind: input, shape index: {}]   ;;  %s1080_s1 = inlined_call_operand.hbm [shape: f32[16,128], index: 1, kind: input, shape index: {}]   ;;  %s1081_s2 = inlined_call_operand.hbm [shape: f32[2,8,128], index: 2, kind: output, shape index: {0}]   ;;  %s1082_s3 = inlined_call_operand.hbm [shape: f32[2,8,128], index: 3, kind: output, shape index: {1}]  }
   0x1   :  { %1087 = sst [smem:[#allocation14_spill]] %s1079_s0 }
   0x2   :  { %9 = vsyncpa [#allocation3], 0 }
   0x3   :  { %11 = vsyncpa [#allocation3 + $0x1], 0 }
   0x4   :  { %12 = vsyncpa [#allocation6], 0 }
   0x5   :  { %14 = vsyncpa [#allocation6 + $0x1], 0 }
   0x6   :  { %15 = vsyncpa [#allocation4], 0 }
   0x7   :  { %17 = vsyncpa [#allocation4 + $0x1], 0 }
   0x8   :  { %18 = vsyncpa [#allocation9], 0 }
   0x9   :  { %20 = vsyncpa [#allocation9 + $0x1], 0  ;;  %s795_s12 = smov 0   ;;  %s797_s13 = smov 0  }
   0xa   :  { %s799_s14 = smov 0   ;;  %s801_s15 = smov 0  }
   0xb   :  { %s803_s16 = smov 0   ;;  %s805_s17 = smov 0  }
   0xc   :  { %s807_s18 = smov 0   ;;  %s809_s19 = smov 0  }
   0xd   :  { %s811_s20 = smov 0  }
   0xe LB: > { %s451_s21 = sadd.s32 4294967295, %s769_s20   ;;  %s452_s22 = sadd.s32 4294967294, %s769_s20   ;;  %s769_s20 = sphi %s811_s20, %s26_s20   ;;  %s765_s19 = sphi %s809_s19, %s1111_s19   ;;  %s761_s18 = sphi %s807_s18, %s1110_s18   ;;  %s757_s17 = sphi %s805_s17, %s1109_s17   ;;  %s753_s16 = sphi %s803_s16, %s1108_s16   ;;  %s749_s15 = sphi %s801_s15, %s1107_s15   ;;  %s745_s14 = sphi %s799_s14, %s1106_s14   ;;  %s741_s13 = sphi %s797_s13, %s1105_s13   ;;  %s737_s12 = sphi %s795_s12, %s1104_s12  }
   0xf   : > { %s38_s23 = sadd.s32 1, %s765_s19  ;;  %p43_p0 = scmp.lt.s32.totalorder %s765_s19, 1 }
  0x10   : > { %p40_p1 = scmp.ge.s32.totalorder %s38_s23, 2  ;;  %s51_s24 = sadd.s32 1, %s757_s17 }
  0x11   : > { %s844_s25 = scalar_select %p43_p0, %s765_s19, 1 }
  0x12   : > { %s1113_s23 = smov (%p40_p1, %s38_s23), 0  ;;  %p58_p2 = scmp.ne.s32.totalorder %s757_s17, %s753_s16 }
  0x13   : > { %p59_p3 = scmp.eq.s32.totalorder %s769_s20, 0  ;;  %p46_p4 = scmp.lt.s32.totalorder %s1113_s23, 1 }
  0x14   : > { %p64_p5 = scmp.ne.s32.totalorder %s753_s16, %s749_s15  ;;  %p65_p7 = scmp.eq.s32.totalorder %s451_s21, 0 }
  0x15   : > { %p853_p6 = por %p59_p3, %p58_p2  ;;  %s106_s29 = ssub.s32 %s765_s19, %s1113_s23 }
  0x16   : > { %s47_s27 = scalar_select %p46_p4, %s1113_s23, 1 }
  0x17   : > { %p858_p8 = por %p65_p7, %p64_p5  ;;  %p107_p9 = scmp.eq.s32.totalorder %s106_s29, 0 }
  0x18   : > { %s48_s30 = ssub.s32 %s844_s25, %s47_s27  ;;  %s109_s4 = sadd.s32 1, %s745_s14 }
  0x19   : > { %s1089_s28 = scalar_select %p858_p8, 1, 0 }
  0x1a   : > { %p49_p10 = scmp.eq.s32.totalorder %s48_s30, 0  ;;  %p119_p11 = scmp.ne.s32.totalorder %s745_s14, %s741_s13 }
  0x1b   : > { %s867_s5 = scalar_select %p107_p9, %s745_s14, %s109_s4  }
  0x1c   : > { %s870_s6 = scalar_select %p49_p10, %s757_s17, %s51_s24  }
  0x1d   : > { %p120_p12 = scmp.eq.s32.totalorder %s451_s21, 1  ;;  %p125_p13 = scmp.ne.s32.totalorder %s741_s13, %s737_s12 }
  0x1e   : > { %p126_p0 = scmp.eq.s32.totalorder %s452_s22, 1  ;;  %p492_p4 = scmp.lt.s32.totalorder %s769_s20, 2 }
  0x1f   : > { %p876_p1 = por %p120_p12, %p119_p11  ;;  %s887_s9 = sand.u32 1, %s757_s17  }
  0x20   : > { %p881_p3 = por %p126_p0, %p125_p13  ;;  %s1084_s10 = sshll.u32 %s844_s25, 7 }
  0x21   : > { %s1090_s7 = scalar_select %p876_p1, 1, 0 }
  0x22   : > { %s1091_s8 = scalar_select %p881_p3, 1, 0 }
  0x23   : > { %s1083_s11 = sshll.u32 %s887_s9, 3  ;;  %s1092_s0 = sld [smem:[#allocation14_spill]] }
  0x24   : > { %s176_s24 = scalar_lea.vmem [#allocation2], %s1083_s11  ;;  %p902_p5 = pnand %p492_p4, %p853_p6 }
  0x25   : > { %s186_s27 = sshll.u32 %s176_s24, 4  ;;  %s173_s30 = scalar_lea.sflag [#allocation3], %s887_s9  ;;  %s906_s27 = int_to_ptr.vmem [resolvable:$true] %s186_s27 }
  0x26   : > { %p569_p11 = pneg %p902_p5 }
  0x29   : > { %s896_s22 = scalar_lea.hbm %s1092_s0, %s1084_s10  ;;  %s572_s21 = scalar_lea.hbm %s1092_s0, 256 }
  0x2a   : > { %s567_s4 = scalar_lea.hbm %s896_s22, 128  ;;  %p573_p6 = scmp.lt.u32.totalorder %s896_s22, %s1092_s0 }
  0x2b   : > { %p568_p10 = scmp.ne.s32.totalorder %s896_s22, %s567_s4  ;;  %p574_p0 = scmp.lt.u32.totalorder %s572_s21, %s567_s4 }
  0x2c   : > { %p576_p2 = scmp.lt.u32.totalorder %s567_s4, %s896_s22 }
  0x2d   : > { %p570_p12 = pnand %p569_p11, %p568_p10  ;;  %p575_p4 = por %p574_p0, %p573_p6 }
  0x2f   : > { %p571_p13 = pneg %p570_p12  ;;  %p577_p7 = por %p576_p2, %p575_p4 }
  0x31   : > { %p578_p9 = pnand %p577_p7, %p571_p13 }
  0x33   : > { %581 = shalt.err (!%p578_p9)
}
  0x34   : > { %s582_s10 = scalar_lea.vmem %s906_s27, 128  ;;  %s771_s26 = smov [#allocation2]  }
  0x35   : > { %p583_p10 = scmp.ne.s32.totalorder %s906_s27, %s582_s10  ;;  %s587_s15 = sshll.u32 %s771_s26, 4  ;;  %s588_s15 = int_to_ptr.vmem [resolvable:$false] %s587_s15 }
  0x36   : > { %s589_s11 = scalar_lea.vmem %s588_s15, 256  ;;  %p590_p1 = scmp.lt.s32.totalorder %s906_s27, %s588_s15 }
  0x37   : > { %p585_p12 = pnand %p583_p10, %p569_p11  ;;  %p591_p6 = scmp.lt.s32.totalorder %s589_s11, %s582_s10 }
  0x39   : > { %p586_p3 = pneg %p585_p12  ;;  %p592_p0 = por %p591_p6, %p590_p1 }
  0x3b   : > { %p593_p2 = pnand %p592_p0, %p586_p3 }
  0x3d   : > { %596 = shalt.err (!%p593_p2)
}
  0x3e   : > { %481 = dma.hbm_to_vmem [thread:$0]  (!%p902_p5), %s896_s22, 128, %s906_s27, %s173_s30  }
  0x3f   : > { %p1094_p7 = scmp.lt.s32.totalorder %s769_s20, 3  ;;  %p1095_p9 = scmp.ge.s32.totalorder %s769_s20, 1 }
  0x40   : > { %s1097_s10 = sshll.u32 %s844_s25, 7  ;;  %s1098_s15 = sshll.u32 %s887_s9, 3 }
  0x41   : > { %p940_p13 = pnand %p1095_p9, %p1094_p7  ;;  %s949_s26 = scalar_lea.hbm %s1080_s1, %s1097_s10 }
  0x42   : > { %s197_s11 = scalar_lea.vmem [#allocation5], %s1098_s15  ;;  %s194_s22 = scalar_lea.sflag [#allocation6], %s887_s9 }
  0x43   : > { %s1096_s4 = scalar_select %p940_p13, 1, 0 }
  0x44   : > { %s207_s0 = sshll.u32 %s197_s11, 4  ;;  %s597_s27 = scalar_lea.hbm %s949_s26, 128  ;;  %s208_s0 = int_to_ptr.vmem [resolvable:$true] %s207_s0 }
  0x45   : > { %p598_p1 = scmp.ne.s32.totalorder %s949_s26, %s597_s27  ;;  %s602_s10 = scalar_lea.hbm %s1080_s1, 256 }
  0x46   : > { %p603_p10 = scmp.lt.u32.totalorder %s949_s26, %s1080_s1  ;;  %p604_p12 = scmp.lt.u32.totalorder %s602_s10, %s597_s27 }
  0x47   : > { %p600_p3 = pnand %p598_p1, %p569_p11  ;;  %p606_p0 = scmp.lt.u32.totalorder %s597_s27, %s949_s26 }
  0x48   : > { %p605_p6 = por %p604_p12, %p603_p10 }
  0x49   : > { %p601_p4 = pneg %p600_p3 }
  0x4a   : > { %p607_p2 = por %p606_p0, %p605_p6 }
  0x4c   : > { %p608_p7 = pnand %p607_p2, %p601_p4 }
  0x4e   : > { %611 = shalt.err (!%p608_p7)
}
  0x4f   : > { %s612_s9 = scalar_lea.vmem %s208_s0, 128  ;;  %s772_s15 = smov [#allocation5]  }
  0x50   : > { %p613_p9 = scmp.ne.s32.totalorder %s208_s0, %s612_s9  ;;  %s617_s11 = sshll.u32 %s772_s15, 4  ;;  %s618_s11 = int_to_ptr.vmem [resolvable:$false] %s617_s11 }
  0x51   : > { %s619_s25 = scalar_lea.vmem %s618_s11, 256  ;;  %p620_p8 = scmp.lt.s32.totalorder %s208_s0, %s618_s11 }
  0x52   : > { %p615_p1 = pnand %p613_p9, %p569_p11  ;;  %p621_p13 = scmp.lt.s32.totalorder %s619_s25, %s612_s9 }
  0x54   : > { %p616_p3 = pneg %p615_p1  ;;  %p622_p10 = por %p621_p13, %p620_p8 }
  0x56   : > { %p623_p12 = pnand %p622_p10, %p616_p3 }
  0x58   : > { %626 = shalt.err (!%p623_p12)
}
  0x59   : > { %484 = dma.hbm_to_vmem [thread:$0]  (!%p902_p5), %s949_s26, 128, %s208_s0, %s194_s22  }
  0x5a   : > { %p1099_p4 = scmp.ne.s32.totalorder %s1096_s4, 0 }
  0x5b   : > { %s218_s27 = sand.u32 (!%p1099_p4), 1, %s753_s16   ;;  %p1100_p11 = scmp.ne.s32.totalorder (!%p1099_p4), %s1089_s28, 0 }
  0x5c   : > { %216 = sbr.rel (%p1099_p4) target bundleno = 153 (0x99), region = 28  ;;  %s460_s30 = sshll.u32 (!%p1099_p4), %s218_s27, 3 }
  0x5d   : > { %s219_s10 = scalar_lea.sflag (!%p1099_p4), [#allocation3], %s218_s27  ;;  %s222_s21 = scalar_lea.vmem (!%p1099_p4), [#allocation2], %s460_s30 }
  0x63   : > { %720 = dma.done.wait (%p1100_p11), %s219_s10, 128  }
  0x64   : > { %722 = vsyncadd (%p1100_p11), %s219_s10, 4294967168  ;;  %s228_s24 = scalar_lea.sflag [#allocation6], %s218_s27  ;;  %s231_s9 = scalar_lea.vmem [#allocation5], %s460_s30 }
  0x65   : > { %724 = dma.done.wait (%p1100_p11), %s228_s24, 128  }
  0x66   : > { %726 = vsyncadd (%p1100_p11), %s228_s24, 4294967168  ;;  %s985_s0 = sand.u32 1, %s741_s13   ;;  %s466_s4 = sshll.u32 %s761_s18, 7  ;;  %v276_v0 = vld [vmem:[%s222_s21] sm:$0xff]  ;;  %v277_v1 = vld [vmem:[%s231_s9] sm:$0xff] }
  0x67   : > { %s462_s29 = sshll.u32 %s985_s0, 3  ;;  %v278_v2 = vmul.f32 %v277_v1, %v276_v0  ;;  %v279_v3 = vadd.f32 %v277_v1, %v276_v0  ;;  %s992_s27 = scalar_lea.hbm %s1081_s2, %s466_s4 }
  0x68   : > { %s256_s26 = scalar_lea.vmem [#allocation7], %s462_s29  ;;  %s263_s15 = scalar_lea.vmem [#allocation8], %s462_s29 }
  0x69   : > { %s305_s22 = sshll.u32 %s256_s26, 4  ;;  %s318_s11 = sshll.u32 %s263_s15, 4  ;;  %282 = vst [vmem:[%s256_s26] sm:$0xff] %v278_v2  ;;  %285 = vst [vmem:[%s263_s15] sm:$0xff] %v279_v3  ;;  %s994_s22 = int_to_ptr.vmem [resolvable:$true] %s305_s22  ;;  %s1001_s11 = int_to_ptr.vmem [resolvable:$true] %s318_s11 }
  0x6a   : > { %s999_s18 = scalar_lea.hbm %s1082_s3, %s466_s4  ;;  %s287_s21 = scalar_lea.sflag [#allocation4], %s985_s0 }
  0x6b   : > { %s627_s24 = scalar_lea.vmem %s994_s22, 128  ;;  %p1101_p5 = scmp.ne.s32.totalorder %s1090_s7, 0 }
  0x6c   : > { %p628_p8 = scmp.ne.s32.totalorder %s994_s22, %s627_s24  ;;  %s773_s9 = smov [#allocation7]  }
  0x6d   : > { %s631_s29 = sshll.u32 %s773_s9, 4  ;;  %s632_s29 = int_to_ptr.vmem [resolvable:$false] %s631_s29 }
  0x6e   : > { %p629_p13 = pnand %p628_p8, %p1101_p5  ;;  %s633_s25 = scalar_lea.vmem %s632_s29, 256 }
  0x6f   : > { %p634_p0 = scmp.lt.s32.totalorder %s994_s22, %s632_s29  ;;  %p635_p2 = scmp.lt.s32.totalorder %s633_s25, %s627_s24 }
  0x70   : > { %p630_p6 = pneg %p629_p13 }
  0x71   : > { %p636_p7 = por %p635_p2, %p634_p0 }
  0x73   : > { %p637_p9 = pnand %p636_p7, %p630_p6 }
  0x75   : > { %640 = shalt.err (!%p637_p9)
}
  0x76   : > { %s641_s4 = scalar_lea.hbm %s992_s27, 128  ;;  %s645_s28 = scalar_lea.hbm %s1081_s2, 256 }
  0x77   : > { %p642_p1 = scmp.ne.s32.totalorder %s992_s27, %s641_s4  ;;  %p646_p12 = scmp.lt.u32.totalorder %s992_s27, %s1081_s2 }
  0x78   : > { %p647_p4 = scmp.lt.u32.totalorder %s645_s28, %s641_s4  ;;  %p649_p8 = scmp.lt.u32.totalorder %s641_s4, %s992_s27 }
  0x79   : > { %p643_p3 = pnand %p642_p1, %p1101_p5 }
  0x7a   : > { %p648_p11 = por %p647_p4, %p646_p12 }
  0x7b   : > { %p644_p10 = pneg %p643_p3 }
  0x7c   : > { %p650_p13 = por %p649_p8, %p648_p11 }
  0x7e   : > { %p651_p6 = pnand %p650_p13, %p644_p10 }
  0x80   : > { %654 = shalt.err (!%p651_p6)
}
  0x81   : > { %474 = dma.vmem_to_hbm [thread:$0]  (%p1101_p5), %s994_s22, 128, %s992_s27, %s287_s21  }
  0x82   : > { %s292_s24 = scalar_lea.sflag [#allocation9], %s985_s0  ;;  %s655_s9 = scalar_lea.vmem %s1001_s11, 128 }
  0x83   : > { %p656_p0 = scmp.ne.s32.totalorder %s1001_s11, %s655_s9  ;;  %s774_s29 = smov [#allocation8]  }
  0x84   : > { %s659_s25 = sshll.u32 %s774_s29, 4  ;;  %s660_s25 = int_to_ptr.vmem [resolvable:$false] %s659_s25 }
  0x85   : > { %p657_p2 = pnand %p656_p0, %p1101_p5  ;;  %s661_s4 = scalar_lea.vmem %s660_s25, 256 }
  0x86   : > { %p662_p9 = scmp.lt.s32.totalorder %s1001_s11, %s660_s25  ;;  %p663_p1 = scmp.lt.s32.totalorder %s661_s4, %s655_s9 }
  0x87   : > { %p658_p7 = pneg %p657_p2 }
  0x88   : > { %p664_p3 = por %p663_p1, %p662_p9 }
  0x8a   : > { %p665_p10 = pnand %p664_p3, %p658_p7 }
  0x8c   : > { %668 = shalt.err (!%p665_p10)
}
  0x8d   : > { %s669_s0 = scalar_lea.hbm %s999_s18, 128  ;;  %s673_s21 = scalar_lea.hbm %s1082_s3, 256 }
  0x8e   : > { %p670_p12 = scmp.ne.s32.totalorder %s999_s18, %s669_s0  ;;  %p674_p8 = scmp.lt.u32.totalorder %s999_s18, %s1082_s3 }
  0x8f   : > { %p675_p13 = scmp.lt.u32.totalorder %s673_s21, %s669_s0  ;;  %p677_p0 = scmp.lt.u32.totalorder %s669_s0, %s999_s18 }
  0x90   : > { %p671_p4 = pnand %p670_p12, %p1101_p5 }
  0x91   : > { %p676_p6 = por %p675_p13, %p674_p8 }
  0x92   : > { %p672_p11 = pneg %p671_p4 }
  0x93   : > { %p678_p2 = por %p677_p0, %p676_p6 }
  0x95   : > { %p679_p7 = pnand %p678_p2, %p672_p11 }
  0x97   : > { %682 = shalt.err (!%p679_p7)
}
  0x98   : > { %475 = dma.vmem_to_hbm [thread:$0]  (%p1101_p5), %s1001_s11, 128, %s999_s18, %s292_s24  }
  0x99 PF: > { %s330_s28 = sand.u32 1, %s737_s12   ;;  %p1102_p9 = scmp.ne.s32.totalorder %s1091_s8, 0 }
  0x9a   : > { %p1103_p1 = scmp.ge.s32.totalorder %s769_s20, 2  ;;  %s331_s30 = scalar_lea.sflag [#allocation4], %s330_s28 }
  0x9c   : > { %p486_p3 = pnand %p1103_p1, %p1102_p9 }
  0x9e   : > { %728 = dma.done.wait (!%p486_p3), %s331_s30, 128  }
  0x9f   : > { %730 = vsyncadd (!%p486_p3), %s331_s30, 4294967168  ;;  %s340_s10 = scalar_lea.sflag [#allocation9], %s330_s28 }
  0xa0   : > { %732 = dma.done.wait (!%p486_p3), %s340_s10, 128  }
  0xa1   : > { %734 = vsyncadd (!%p486_p3), %s340_s10, 4294967168  ;;  %s26_s20 = sadd.s32 1, %s769_s20   ;;  %s1104_s12 = smov %s741_s13 }
  0xa2   : > { %p23_p10 = scmp.ge.s32.totalorder %s26_s20, 4   ;;  %s1105_s13 = smov %s745_s14 }
  0xa3   : > { %s1106_s14 = smov %s867_s5  ;;  %s1107_s15 = smov %s753_s16 }
  0xa4   : > { %s1108_s16 = smov %s757_s17  ;;  %s1109_s17 = smov %s870_s6 }
  0xa5   : > { %s1110_s18 = smov %s765_s19  ;;  %s1111_s19 = smov %s1113_s23 }
  0xa6   :  { %25 = sbr.rel (!%p23_p10) target bundleno = 14 (0xe), region = 107 }
  0xad   :  { %345 = vsyncpa [#allocation3], 1 }
  0xae   :  { %347 = vsyncpa [#allocation3 + $0x1], 1 }
  0xaf   :  { %348 = vsyncpa [#allocation6], 1 }
  0xb0   :  { %350 = vsyncpa [#allocation6 + $0x1], 1 }
  0xb1   :  { %351 = vsyncpa [#allocation4], 1 }
  0xb2   :  { %353 = vsyncpa [#allocation4 + $0x1], 1 }
  0xb3   :  { %354 = vsyncpa [#allocation9], 1 }
  0xb4   :  { %356 = vsyncpa [#allocation9 + $0x1], 1 }

</bundles_post_ra>
